<compile_context>
chip_gen: v5e
topology: v5e:2x2
jax: 0.10.0
libtpu: 0.0.40
codegen_flags: <defaults>
</compile_context>

<pallas_src>
import functools

import jax
import jax.numpy as jnp
from jax.experimental import pallas as pl
from jax.experimental.pallas import tpu as pltpu


BN_EPS = 1e-5
LRELU_SLOPE = 0.2
LANES = 128
TILE_M = 256  # rows (of N*Ho*Wo) per grid step


def _round_up(v, m):
    return (v + m - 1) // m * m


def _conv_stats_kernel(x_ref, w_ref, b_ref, y_ref, stats_ref, *, tm, m_real):
    """Pass 1: conv-as-matmul (bf16 MXU, f32 acc) + per-tile partial BN stats."""
    i = pl.program_id(0)
    # [tm, Kpad] @ [Kpad, Cpad] -> [tm, Cpad], f32 accumulation on the MXU.
    y = jnp.dot(x_ref[...], w_ref[...],
                preferred_element_type=jnp.float32) + b_ref[...]
    # Zero rows that are only M-padding so they do not pollute the statistics.
    row = jax.lax.broadcasted_iota(jnp.int32, y.shape, 0) + i * tm
    y = jnp.where(row < m_real, y, 0.0)
    y_ref[...] = y
    # One pass: per-channel sum and sum-of-squares (var derived later).
    stats_ref[0:1, :] = jnp.sum(y, axis=0, keepdims=True)
    stats_ref[1:2, :] = jnp.sum(y * y, axis=0, keepdims=True)


def _bn_lrelu_kernel(y_ref, stats_ref, params_ref, o_ref, *, inv_m):
    """Pass 2: fused BN affine (scale/shift) + LeakyReLU(0.2)."""
    mean = stats_ref[0:1, :] * inv_m
    var = stats_ref[1:2, :] * inv_m - mean * mean          # biased variance
    gamma = params_ref[0:1, :]
    beta = params_ref[1:2, :]
    scale = gamma * jax.lax.rsqrt(var + BN_EPS)            # rsqrt on the EUP
    shift = beta - mean * scale
    z = y_ref[...] * scale + shift                          # one FMA / element
    o_ref[...] = jnp.where(z >= 0.0, z, LRELU_SLOPE * z)


def conv_layer_forward(x_nchw, w_oihw, b, gamma, beta, *, stride=1, padding=1,
                       tile_m=TILE_M):
    """Forward of conv_layer.  x_nchw: [N, Cin, H, W] -> [N, Cout, Ho, Wo]."""
    N, Cin, H, W = x_nchw.shape
    Cout, Cin_w, KH, KW = w_oihw.shape
    assert Cin == Cin_w

    Ho = (H + 2 * padding - KH) // stride + 1
    Wo = (W + 2 * padding - KW) // stride + 1
    M = N * Ho * Wo
    Kd = KH * KW * Cin

    Kpad = _round_up(Kd, LANES)          # MXU-friendly contraction dim
    Cpad = _round_up(Cout, LANES)        # lane-dense output channels
    tm = min(tile_m, _round_up(M, 8))    # row tile (multiple of 8 sublanes)
    nt = pl.cdiv(M, tm)
    Mpad = nt * tm

    # ---- glue: im2col in plain JAX (NHWC internally) ----
    # TODO(synk): im2col could be moved into the kernel (DMA NHWC tiles and
    # build the KH*KW shifted views in VMEM) to cut ~9x HBM read traffic.
    x_nhwc = jnp.transpose(x_nchw, (0, 2, 3, 1))
    x_pad = jnp.pad(x_nhwc, ((0, 0), (padding, padding), (padding, padding), (0, 0)))
    patch_list = []
    for kh in range(KH):
        for kw in range(KW):
            patch_list.append(
                x_pad[:, kh:kh + stride * Ho:stride, kw:kw + stride * Wo:stride, :]
            )  # [N, Ho, Wo, Cin]
    # feature ordering: (kh, kw, cin)
    patches = jnp.stack(patch_list, axis=3)                 # [N, Ho, Wo, KH*KW, Cin]
    X = patches.reshape(M, Kd)
    X = jnp.pad(X, ((0, Mpad - M), (0, Kpad - Kd))).astype(jnp.bfloat16)

    # weight OIHW -> (KH, KW, Cin, Cout) -> [Kd, Cout] -> zero-padded [Kpad, Cpad]
    W_mat = jnp.transpose(w_oihw, (2, 3, 1, 0)).reshape(Kd, Cout)
    W_mat = jnp.pad(W_mat, ((0, Kpad - Kd), (0, Cpad - Cout))).astype(jnp.bfloat16)

    b_row = jnp.pad(b.reshape(1, Cout).astype(jnp.float32),
                    ((0, 0), (0, Cpad - Cout)))                       # [1, Cpad]
    params = jnp.pad(jnp.stack([gamma, beta], axis=0).astype(jnp.float32),
                     ((0, 0), (0, Cpad - Cout)))                      # [2, Cpad]

    cparams = pltpu.CompilerParams(
        dimension_semantics=("parallel",),
        vmem_limit_bytes=48 << 20,
    )

    # ---- pass 1: conv matmul + per-tile partial BatchNorm statistics ----
    y_flat, stats_part = pl.pallas_call(
        functools.partial(_conv_stats_kernel, tm=tm, m_real=M),
        grid=(nt,),
        in_specs=[
            pl.BlockSpec((tm, Kpad), lambda i: (i, 0)),       # X tile stream
            pl.BlockSpec((Kpad, Cpad), lambda i: (0, 0)),     # W (resident)
            pl.BlockSpec((1, Cpad), lambda i: (0, 0)),        # bias (resident)
        ],
        out_specs=[
            pl.BlockSpec((tm, Cpad), lambda i: (i, 0)),                # y
            pl.BlockSpec((None, 2, Cpad), lambda i: (i, 0, 0)),        # partial stats
        ],
        out_shape=[
            jax.ShapeDtypeStruct((Mpad, Cpad), jnp.float32),
            jax.ShapeDtypeStruct((nt, 2, Cpad), jnp.float32),
        ],
        compiler_params=cparams,
    )(X, W_mat, b_row)

    # Tiny, megacore-safe cross-tile combine of the partial stats.
    stats = jnp.sum(stats_part, axis=0)                       # [2, Cpad]

    # ---- pass 2: normalize + affine + LeakyReLU ----
    out_flat = pl.pallas_call(
        functools.partial(_bn_lrelu_kernel, inv_m=1.0 / M),
        grid=(nt,),
        in_specs=[
            pl.BlockSpec((tm, Cpad), lambda i: (i, 0)),       # y tile stream
            pl.BlockSpec((2, Cpad), lambda i: (0, 0)),        # reduced stats
            pl.BlockSpec((2, Cpad), lambda i: (0, 0)),        # gamma/beta
        ],
        out_specs=pl.BlockSpec((tm, Cpad), lambda i: (i, 0)),
        out_shape=jax.ShapeDtypeStruct((Mpad, Cpad), jnp.float32),
        compiler_params=cparams,
    )(y_flat, stats, params)

    out = out_flat[:M, :Cout].reshape(N, Ho, Wo, Cout)
    return jnp.transpose(out, (0, 3, 1, 2))


def _reference(x, w, b, gamma, beta, stride, padding):
    """Pure-JAX f32 reference (PyTorch conv_layer forward, BN in train mode)."""
    y = jax.lax.conv_general_dilated(
        x, w, window_strides=(stride, stride),
        padding=((padding, padding), (padding, padding)),
        dimension_numbers=("NCHW", "OIHW", "NCHW"))
    y = y + b.reshape(1, -1, 1, 1)
    mean = jnp.mean(y, axis=(0, 2, 3), keepdims=True)
    var = jnp.mean((y - mean) ** 2, axis=(0, 2, 3), keepdims=True)
    z = (gamma.reshape(1, -1, 1, 1) * (y - mean) * jax.lax.rsqrt(var + BN_EPS)
         + beta.reshape(1, -1, 1, 1))
    return jnp.where(z >= 0, z, LRELU_SLOPE * z)


if __name__ == "__main__":
    # conv_layer(in_channel=4, out_channel=8, kernel=3, stride=1, padding=1)
    N, Cin, H, W = 2, 4, 16, 16
    Cout, K = 8, 3

    key = jax.random.PRNGKey(0)
    k_x, k_w, k_b = jax.random.split(key, 3)

    x = jax.random.normal(k_x, (N, Cin, H, W), dtype=jnp.float32)
    fan_in = Cin * K * K
    bound = 1.0 / (fan_in ** 0.5)
    w_conv = jax.random.uniform(k_w, (Cout, Cin, K, K), jnp.float32, -bound, bound)
    b_conv = jax.random.uniform(k_b, (Cout,), jnp.float32, -bound, bound)
    gamma = jnp.ones((Cout,), jnp.float32)     # BatchNorm default affine init
    beta = jnp.zeros((Cout,), jnp.float32)

    out = conv_layer_forward(x, w_conv, b_conv, gamma, beta, stride=1, padding=1)
    out = jax.block_until_ready(out)
    assert out.shape == (N, Cout, H, W), out.shape

    ref = jax.block_until_ready(_reference(x, w_conv, b_conv, gamma, beta, 1, 1))
    max_err = float(jnp.max(jnp.abs(out - ref)))
    assert max_err < 0.1, f"max abs error vs reference: {max_err}"

    print("KERNEL_OK")
</pallas_src>

<mosaic_0001>
module attributes {stable_mosaic.version = 11 : i64} {
  func.func @_conv_stats_kernel(%arg0: i32, %arg1: memref<256x128xbf16, #tpu.memory_space<vmem>>, %arg2: memref<128x128xbf16, #tpu.memory_space<vmem>>, %arg3: memref<1x128xf32, #tpu.memory_space<vmem>>, %arg4: memref<256x128xf32, #tpu.memory_space<vmem>>, %arg5: memref<1x2x128xf32, #tpu.memory_space<vmem>>) attributes {dimension_semantics = [#tpu.dimension_semantics<parallel>], iteration_bounds = array<i64: 2>, scalar_prefetch = 0 : i64, scratch_operands = 0 : i64, tpu.core_type = #tpu.core_type<tc>, window_params = [{transform_indices = @transform_0, window_bounds = array<i64: 256, 128>}, {pipeline_mode = #tpu.pipeline_mode<synchronous>, transform_indices = @transform_1, window_bounds = array<i64: 128, 128>}, {pipeline_mode = #tpu.pipeline_mode<synchronous>, transform_indices = @transform_2, window_bounds = array<i64: 1, 128>}, {transform_indices = @transform_3, window_bounds = array<i64: 256, 128>}, {transform_indices = @transform_4, window_bounds = array<i64: 1, 2, 128>}]} {
    %c0 = arith.constant 0 : index
    %c0_0 = arith.constant 0 : index
    %0 = vector.load %arg1[%c0, %c0_0] : memref<256x128xbf16, #tpu.memory_space<vmem>>, vector<256x128xbf16>
    %c0_1 = arith.constant 0 : index
    %c0_2 = arith.constant 0 : index
    %1 = vector.load %arg2[%c0_1, %c0_2] : memref<128x128xbf16, #tpu.memory_space<vmem>>, vector<128x128xbf16>
    %cst = arith.constant dense<0.000000e+00> : vector<256x128xf32>
    %2 = tpu.matmul %0, %1, %cst {dimension_numbers = #tpu.dot_dimension_numbers<[1], [0], [0], [1], [0, 0, 1, 1], [], []>} : vector<256x128xbf16>, vector<128x128xbf16>, vector<256x128xf32> -> vector<256x128xf32>
    %c0_3 = arith.constant 0 : index
    %c0_4 = arith.constant 0 : index
    %3 = vector.load %arg3[%c0_3, %c0_4] : memref<1x128xf32, #tpu.memory_space<vmem>>, vector<1x128xf32>
    %4 = vector.broadcast %3 : vector<1x128xf32> to vector<256x128xf32>
    %5 = arith.addf %2, %4 : vector<256x128xf32>
    %6 = tpu.iota {dimensions = array<i32: 0>} : vector<256x128xi32>
    %c256_i32 = arith.constant 256 : i32
    %7 = arith.muli %arg0, %c256_i32 : i32
    %8 = vector.broadcast %7 : i32 to vector<256x128xi32>
    %9 = arith.addi %6, %8 : vector<256x128xi32>
    %c512_i32 = arith.constant 512 : i32
    %10 = vector.broadcast %c512_i32 : i32 to vector<256x128xi32>
    %11 = arith.cmpi slt, %9, %10 : vector<256x128xi32>
    %cst_5 = arith.constant 0.000000e+00 : f32
    %12 = vector.broadcast %cst_5 : f32 to vector<256x128xf32>
    %13 = arith.select %11, %5, %12 : vector<256x128xi1>, vector<256x128xf32>
    %c0_6 = arith.constant 0 : index
    %c0_7 = arith.constant 0 : index
    %14 = vector.load %arg4[%c0_6, %c0_7] : memref<256x128xf32, #tpu.memory_space<vmem>>, vector<256x128xf32>
    tpu.vector_store %arg4[%c0_6, %c0_7], %13 {strides = array<i32>} : memref<256x128xf32, #tpu.memory_space<vmem>>, vector<256x128xf32>,
    %cst_8 = arith.constant dense<0.000000e+00> : vector<128xf32>
    %15 = vector.multi_reduction <add>, %13, %cst_8 [0] : vector<256x128xf32> to vector<128xf32>
    %16 = vector.shape_cast %15 : vector<128xf32> to vector<1x128xf32>
    %c0_9 = arith.constant 0 : index
    %c0_10 = arith.constant 0 : index
    %c0_11 = arith.constant 0 : index
    %17 = vector.load %arg5[%c0_9, %c0_10, %c0_11] : memref<1x2x128xf32, #tpu.memory_space<vmem>>, vector<1x1x128xf32>
    %18 = vector.shape_cast %17 : vector<1x1x128xf32> to vector<1x128xf32>
    %19 = vector.shape_cast %16 : vector<1x128xf32> to vector<1x1x128xf32>
    tpu.vector_store %arg5[%c0_9, %c0_10, %c0_11], %19 {strides = array<i32>} : memref<1x2x128xf32, #tpu.memory_space<vmem>>, vector<1x1x128xf32>,
    %20 = arith.mulf %13, %13 : vector<256x128xf32>
    %cst_12 = arith.constant dense<0.000000e+00> : vector<128xf32>
    %21 = vector.multi_reduction <add>, %20, %cst_12 [0] : vector<256x128xf32> to vector<128xf32>
    %22 = vector.shape_cast %21 : vector<128xf32> to vector<1x128xf32>
    %c0_13 = arith.constant 0 : index
    %c1 = arith.constant 1 : index
    %c0_14 = arith.constant 0 : index
    %23 = vector.load %arg5[%c0_13, %c1, %c0_14] : memref<1x2x128xf32, #tpu.memory_space<vmem>>, vector<1x1x128xf32>
    %24 = vector.shape_cast %23 : vector<1x1x128xf32> to vector<1x128xf32>
    %25 = vector.shape_cast %22 : vector<1x128xf32> to vector<1x1x128xf32>
    tpu.vector_store %arg5[%c0_13, %c1, %c0_14], %25 {strides = array<i32>} : memref<1x2x128xf32, #tpu.memory_space<vmem>>, vector<1x1x128xf32>,
    return
  }
  func.func @transform_0(%arg0: i32) -> (i32, i32) {
    %c0_i32 = arith.constant 0 : i32
    %c0_i32_0 = arith.constant 0 : i32
    return %arg0, %c0_i32 : i32, i32
  }
  func.func @transform_1(%arg0: i32) -> (i32, i32) {
    %c0_i32 = arith.constant 0 : i32
    %c0_i32_0 = arith.constant 0 : i32
    %c0_i32_1 = arith.constant 0 : i32
    return %c0_i32, %c0_i32_0 : i32, i32
  }
  func.func @transform_2(%arg0: i32) -> (i32, i32) {
    %c0_i32 = arith.constant 0 : i32
    %c0_i32_0 = arith.constant 0 : i32
    %c0_i32_1 = arith.constant 0 : i32
    return %c0_i32, %c0_i32_0 : i32, i32
  }
  func.func @transform_3(%arg0: i32) -> (i32, i32) {
    %c0_i32 = arith.constant 0 : i32
    %c0_i32_0 = arith.constant 0 : i32
    return %arg0, %c0_i32 : i32, i32
  }
  func.func @transform_4(%arg0: i32) -> (i32, i32, i32) {
    %c0_i32 = arith.constant 0 : i32
    %c0_i32_0 = arith.constant 0 : i32
    %c0_i32_1 = arith.constant 0 : i32
    return %arg0, %c0_i32, %c0_i32_0 : i32, i32, i32
  }
}

</mosaic_0001>

<bundles_post_ra>
// kernel: tpu_custom_call.1
= control target key start
LH: loop header
LB: loop body
LE: loop exit
PB: predicated region body
PF: predicated region fallthrough
CT: control target
= control target key end

     0   :  { %10 = vsyncpa [#allocation3], 0  ;;  %s1894_s0 = inlined_call_operand.hbm [shape: bf16[512,128], index: 0, kind: input, shape index: {}]   ;;  %s1895_s1 = inlined_call_operand.hbm [shape: bf16[128,128], index: 1, kind: input, shape index: {}]   ;;  %s1896_s2 = inlined_call_operand.vmem [shape: f32[1,128], index: 2, kind: input, shape index: {}]   ;;  %s1897_s3 = inlined_call_operand.hbm [shape: f32[512,128], index: 3, kind: output, shape index: {0}]   ;;  %s1898_s4 = inlined_call_operand.hbm [shape: f32[2,2,128], index: 4, kind: output, shape index: {1}]  }
   0x1   :  { %12 = vsyncpa [#allocation3 + $0x1], 0 }
   0x2   :  { %13 = vsyncpa [#allocation6], 0 }
   0x3   :  { %14 = vsyncpa [#allocation4], 0 }
   0x4   :  { %16 = vsyncpa [#allocation4 + $0x1], 0 }
   0x5   :  { %17 = vsyncpa [#allocation9], 0 }
   0x6   :  { %19 = vsyncpa [#allocation9 + $0x1], 0  ;;  %s1382_s15 = smov 0   ;;  %s1384_s16 = smov 0  }
   0x7   :  { %s1386_s17 = smov 0   ;;  %s1388_s18 = smov 0  }
   0x8 LB: > { %s1403_s19 = sadd.s32 4294967295, %s1350_s18   ;;  %s955_s20 = sadd.s32 4294967294, %s1350_s18   ;;  %s1350_s18 = sphi %s1388_s18, %s1908_s18   ;;  %s1346_s17 = sphi %s1386_s17, %s1907_s17   ;;  %s1342_s16 = sphi %s1384_s16, %s1906_s16   ;;  %s1338_s15 = sphi %s1382_s15, %s1905_s15  }
   0x9   : > { %p45_p0 = scmp.ne.s32.totalorder %s1342_s16, %s1338_s15  ;;  %p46_p1 = scmp.eq.s32.totalorder %s1403_s19, 0 }
   0xa   : > { %p111_p2 = scmp.eq.s32.totalorder %s1403_s19, 1  ;;  %p117_p3 = scmp.eq.s32.totalorder %s955_s20, 1 }
   0xb   : > { %p1412_p4 = por %p46_p1, %p45_p0  ;;  %p956_p5 = scmp.ge.s32.totalorder %s1350_s18, 1 }
   0xc   : > { %p1417_p6 = por %p117_p3, %p45_p0  ;;  %p150_p7 = scmp.lt.s32.totalorder %s1350_s18, 3 }
   0xd   : > { %s161_s25 = sshll.u32 %s1895_s1, 4  ;;  %s1352_s27 = smov [#allocation5]   ;;  %s162_s25 = int_to_ptr.hbm [resolvable:$true] %s161_s25 }
   0xe   : > { %p1425_p8 = pnand %p956_p5, %p150_p7  ;;  %s163_s28 = sshll.u32 %s1352_s27, 4  ;;  %s164_s28 = int_to_ptr.vmem [resolvable:$true] %s163_s28 }
   0xf   : > { %s1435_s29 = sadd.s32 1, %s1350_s18   ;;  %s1353_s30 = smov 64  }
  0x10   : > { %p1131_p9 = pneg %p1425_p8  ;;  %s1354_s5 = smov 4  }
  0x11   : > { %s29_s6 = ssub.s32 %s1350_s18, %s1435_s29  ;;  %s32_s7 = sadd.s32 1, %s1346_s17 }
  0x12   : > { %p1132_p10 = pnand %p1131_p9, %p46_p1  ;;  %p30_p12 = scmp.eq.s32.totalorder %s29_s6, 0 }
  0x13   : > { %p39_p13 = scmp.ne.s32.totalorder %s1346_s17, %s1342_s16  ;;  %p40_p0 = scmp.eq.s32.totalorder %s1350_s18, 0 }
  0x14   : > { %1134 = dma.hbm_to_vmem [thread:$0]  (!%p1132_p10), %s162_s25, 1024, %s164_s28, [#allocation6], %s1353_s30, %s1353_s30, %s1354_s5  }
  0x15   : > { %s1447_s8 = scalar_select %p30_p12, %s1346_s17, %s32_s7  }
  0x16   : > { %p1451_p3 = por %p111_p2, %p39_p13  ;;  %p1147_p5 = scmp.lt.s32.totalorder %s1350_s18, 2 }
  0x17   : > { %s180_s10 = sand.u32 1, %s1346_s17   ;;  %s1071_s11 = sshll.u32 %s1350_s18, 7 }
  0x18   : > { %p41_p7 = por %p40_p0, %p39_p13  ;;  %s959_s12 = sshll.u32 %s180_s10, 7 }
  0x19   : > { %s189_s20 = scalar_lea.hbm %s1894_s0, %s1071_s11  ;;  %s184_s24 = scalar_lea.vmem [#allocation2], %s959_s12 }
  0x1a   : > { %s190_s23 = sshll.u32 %s189_s20, 4  ;;  %s192_s25 = sshll.u32 %s184_s24, 4  ;;  %s191_s23 = int_to_ptr.hbm [resolvable:$true] %s190_s23  ;;  %s193_s25 = int_to_ptr.vmem [resolvable:$true] %s192_s25 }
  0x1b   : > { %p1461_p9 = pnand %p1147_p5, %p41_p7  ;;  %s181_s28 = scalar_lea.sflag [#allocation3], %s180_s10 }
  0x1c   : > { %s1218_s6 = sshra.s32 %s191_s23, 4  ;;  %s1225_s12 = scalar_lea.hbm %s1894_s0, 256  ;;  %s1219_s6 = int_to_ptr.hbm [resolvable:$true] %s1218_s6 }
  0x1d   : > { %s1220_s7 = scalar_lea.hbm %s1219_s6, 128  ;;  %p1222_p10 = pneg %p1461_p9 }
  0x1e   : > { %p1221_p2 = scmp.ne.s32.totalorder %s1219_s6, %s1220_s7  ;;  %p1226_p0 = scmp.lt.s32.totalorder %s1219_s6, %s1894_s0 }
  0x1f   : > { %p1227_p5 = scmp.lt.s32.totalorder %s1225_s12, %s1220_s7 }
  0x20   : > { %p1223_p12 = pnand %p1222_p10, %p1221_p2 }
  0x21   : > { %p1228_p7 = por %p1227_p5, %p1226_p0 }
  0x22   : > { %p1224_p13 = pneg %p1223_p12 }
  0x24   : > { %p1229_p11 = pnand %p1228_p7, %p1224_p13 }
  0x26   : > { %1232 = shalt.err (!%p1229_p11)
}
  0x27   : > { %1138 = dma.hbm_to_vmem [thread:$0]  (!%p1461_p9), %s191_s23, 2048, %s193_s25, %s181_s28, %s1353_s30, %s1353_s30, %s1354_s5  }
  0x28   : > { %204 = sbr.rel (%p1425_p8) target bundleno = 332 (0x14c), region = 32  ;;  %s1481_s10 = sand.u32 (!%p1425_p8), 1, %s1342_s16  }
  0x29   : > { %s963_s24 = sshll.u32 (!%p1425_p8), %s1481_s10, 7  ;;  %s207_s6 = scalar_lea.sflag (!%p1425_p8), [#allocation3], %s1481_s10 }
  0x2a   : > { %s1485_s7 = scalar_lea.vmem (!%p1425_p8), [#allocation2], %s963_s24 }
  0x2d   : > { %1321 = dma.done.wait (%p1412_p4), %s207_s6, 2048  }
  0x2e   : > { %1323 = vsyncadd (%p1412_p4), %s207_s6, 4294965248 }
  0x2f   : > { %1325 = dma.done.wait (%p46_p1), [#allocation6], 1024  }
  0x30   : > { %1327 = vsyncadd (%p46_p1), [#allocation6], 4294966272  ;;  %v1095_v0 = vld [vmem:[#allocation5 + $0x38] sm:$0xff]  ;;  %v1094_v1 = vld [vmem:[#allocation5 + $0x30] sm:$0xff]  ;;  %v533_v24 = vlaneseq  ;;  %s1063_s21 = sshll.u32 %s1403_s19, 8  ;;  %s965_s5 = sshll.u32 %s1481_s10, 8 }
  0x31   : > { %444 = vmatpush.bf16.msra.mxu0 %v1095_v0  ;;  %1097 = vmatpush.bf16.msra.mxu1 %v1095_v0  ;;  %v1093_v2 = vld [vmem:[#allocation5 + $0x28] sm:$0xff]  ;;  %v1092_v3 = vld [vmem:[#allocation5 + $0x20] sm:$0xff]  ;;  %v1091_v4 = vld [vmem:[#allocation5 + $0x18] sm:$0xff]  ;;  %v1517_v27 = vstv %s1063_s21  ;;  %s1538_s23 = scalar_lea.vmem [#allocation7], %s965_s5  ;;  %s821_s28 = scalar_lea.hbm %s1897_s3, %s1063_s21 }
  0x32   : > { %1098 = vmatpush.bf16.msra.mxu2 %v1095_v0  ;;  %1099 = vmatpush.bf16.msra.mxu3 %v1095_v0  ;;  %v1090_v5 = vld [vmem:[#allocation5 + $0x10] sm:$0xff]  ;;  %v1089_v6 = vld [vmem:[#allocation5 + $0x8] sm:$0xff]  ;;  %v1088_v7 = vld [vmem:[#allocation5] sm:$0xff]  ;;  %v1511_v25 = vshrl.u32 %v533_v24, 7  ;;  %s822_s11 = sshll.u32 %s1538_s23, 4  ;;  %s824_s13 = sshll.u32 %s821_s28, 4  ;;  %s1773_s11 = int_to_ptr.vmem [resolvable:$true] %s822_s11  ;;  %s1775_s13 = int_to_ptr.hbm [resolvable:$true] %s824_s13 }
  0x33   : > { %v1072_v8 = vld [vmem:[%s1485_s7] sm:$0xff]  ;;  %v1073_v12 = vld [vmem:[%s1485_s7 + $0x8] sm:$0xff]  ;;  %v1074_v16 = vld [vmem:[%s1485_s7 + $0x10] sm:$0xff]  ;;  %s805_s12 = scalar_lea.sflag [#allocation4], %s1481_s10  ;;  %s1262_s14 = sshra.s32 %s1775_s13, 4  ;;  %s1263_s14 = int_to_ptr.hbm [resolvable:$true] %s1262_s14 }
  0x34   : > { %v1076_v9 = vld [vmem:[%s1485_s7 + $0x20] sm:$0xff]  ;;  %v1077_v13 = vld [vmem:[%s1485_s7 + $0x28] sm:$0xff]  ;;  %v1078_v17 = vld [vmem:[%s1485_s7 + $0x30] sm:$0xff]  ;;  %v542_v26 = vadd.s32 64, %v1511_v25  ;;  %v568_v28 = vadd.s32 %v1517_v27, %v1511_v25  ;;  %v550_v31 = vadd.s32 128, %v1511_v25  ;;  %v535_v33 = vadd.s32 8, %v1511_v25  ;;  %p1269_p11 = scmp.lt.s32.totalorder %s1263_s14, %s1897_s3 }
  0x35   : > { %445 = vmatpush.bf16.msra.mxu0 %v1094_v1  ;;  %1100 = vmatpush.bf16.msra.mxu1 %v1094_v1  ;;  %v1080_v10 = vld [vmem:[%s1485_s7 + $0x40] sm:$0xff]  ;;  %v1081_v14 = vld [vmem:[%s1485_s7 + $0x48] sm:$0xff]  ;;  %v1082_v18 = vld [vmem:[%s1485_s7 + $0x50] sm:$0xff]  ;;  %v543_v35 = vadd.s32 72, %v1511_v25  ;;  %v536_v43 = vadd.s32 16, %v1511_v25  ;;  %v551_v45 = vadd.s32 136, %v1511_v25 }
  0x36   : > { %1101 = vmatpush.bf16.msra.mxu2 %v1094_v1  ;;  %1102 = vmatpush.bf16.msra.mxu3 %v1094_v1  ;;  %v1084_v11 = vld [vmem:[%s1485_s7 + $0x60] sm:$0xff]  ;;  %v1085_v15 = vld [vmem:[%s1485_s7 + $0x68] sm:$0xff]  ;;  %v1086_v19 = vld [vmem:[%s1485_s7 + $0x70] sm:$0xff]  ;;  %v576_v29 = vadd.s32 %v1517_v27, %v542_v26  ;;  %vm600_vm0 = vcmp.lt.s32.totalorder %v568_v28, 512  ;;  %v584_v40 = vadd.s32 %v1517_v27, %v550_v31  ;;  %v569_v41 = vadd.s32 %v1517_v27, %v535_v33  ;;  %s1264_s20 = scalar_lea.hbm %s1263_s14, 256 }
  0x37   : > { %v1075_v20 = vld [vmem:[%s1485_s7 + $0x18] sm:$0xff]  ;;  %v1525_v30 = vld [vmem:[%s1896_s2] ss:$0 sm:$0xff]  ;;  %v577_v42 = vadd.s32 %v1517_v27, %v543_v35  ;;  %v544_v48 = vadd.s32 80, %v1511_v25  ;;  %v570_v55 = vadd.s32 %v1517_v27, %v536_v43  ;;  %v585_v57 = vadd.s32 %v1517_v27, %v551_v45  ;;  %p1265_p1 = scmp.ne.s32.totalorder %s1263_s14, %s1264_s20 }
  0x38   : > { %v1079_v21 = vld [vmem:[%s1485_s7 + $0x38] sm:$0xff]  ;;  %vm608_vm1 = vcmp.lt.s32.totalorder %v576_v29, 512  ;;  %vm616_vm2 = vcmp.lt.s32.totalorder %v584_v40, 512  ;;  %vm601_vm3 = vcmp.lt.s32.totalorder %v569_v41, 512  ;;  %v537_v59 = vadd.s32 24, %v1511_v25 }
  0x39   : > { %446 = vmatpush.bf16.msra.mxu0 %v1093_v2  ;;  %1103 = vmatpush.bf16.msra.mxu1 %v1093_v2  ;;  %v1083_v22 = vld [vmem:[%s1485_s7 + $0x58] sm:$0xff]  ;;  %vm609_vm4 = vcmp.lt.s32.totalorder %v577_v42, 512  ;;  %v578_v58 = vadd.s32 %v1517_v27, %v544_v48  ;;  %vm602_vm5 = vcmp.lt.s32.totalorder %v570_v55, 512  ;;  %vm617_vm6 = vcmp.lt.s32.totalorder %v585_v57, 512  ;;  %p1266_p4 = pnand %p1265_p1, %p1451_p3 }
  0x3a   : > { %1104 = vmatpush.bf16.msra.mxu2 %v1093_v2  ;;  %1105 = vmatpush.bf16.msra.mxu3 %v1093_v2  ;;  %v1087_v23 = vld [vmem:[%s1485_s7 + $0x78] sm:$0xff]  ;;  %v552_v61 = vadd.s32 144, %v1511_v25  ;;  %v558_v62 = vadd.s32 192, %v1511_v25  ;;  %v545_v1 = vadd.s32 88, %v1511_v25  ;;  %v539_v40 = vadd.s32 40, %v1511_v25  ;;  %s1268_s7 = scalar_lea.hbm %s1897_s3, 512 }
  0x3b   : > { %vm610_vm7 = vcmp.lt.s32.totalorder %v578_v58, 512  ;;  %v560_v41 = vadd.s32 208, %v1511_v25  ;;  %v554_v43 = vadd.s32 160, %v1511_v25  ;;  %v561_v55 = vadd.s32 216, %v1511_v25  ;;  %p1267_p8 = pneg %p1266_p4  ;;  %p1270_p9 = scmp.lt.s32.totalorder %s1268_s7, %s1264_s20 }
  0x3c   : > { %v573_v57 = vadd.s32 %v1517_v27, %v539_v40  ;;  %v562_v40 = vadd.s32 224, %v1511_v25 }
  0x3d   : > { %447 = vmatpush.bf16.msra.mxu0 %v1092_v3  ;;  %1106 = vmatpush.bf16.msra.mxu1 %v1092_v3  ;;  %v594_v48 = vadd.s32 %v1517_v27, %v560_v41  ;;  %p1271_p2 = por %p1270_p9, %p1269_p11 }
  0x3e   : > { %1107 = vmatpush.bf16.msra.mxu2 %v1092_v3  ;;  %1108 = vmatpush.bf16.msra.mxu3 %v1092_v3 }
  0x3f   : > { %p1272_p10 = pnand %p1271_p2, %p1267_p8 }
  0x41   : > { %448 = vmatpush.bf16.msra.mxu0 %v1091_v4  ;;  %1109 = vmatpush.bf16.msra.mxu1 %v1091_v4 }
  0x42   : > { %1110 = vmatpush.bf16.msra.mxu2 %v1091_v4  ;;  %1111 = vmatpush.bf16.msra.mxu3 %v1091_v4 }
  0x45   : > { %449 = vmatpush.bf16.msra.mxu0 %v1090_v5  ;;  %1112 = vmatpush.bf16.msra.mxu1 %v1090_v5 }
  0x46   : > { %1113 = vmatpush.bf16.msra.mxu2 %v1090_v5  ;;  %1114 = vmatpush.bf16.msra.mxu3 %v1090_v5 }
  0x49   : > { %450 = vmatpush.bf16.msra.mxu0 %v1089_v6  ;;  %1115 = vmatpush.bf16.msra.mxu1 %v1089_v6 }
  0x4a   : > { %1116 = vmatpush.bf16.msra.mxu2 %v1089_v6  ;;  %1117 = vmatpush.bf16.msra.mxu3 %v1089_v6  ;;  %v592_v6 = vadd.s32 %v1517_v27, %v558_v62 }
  0x4c   : > { %vm624_vm8 = vcmp.lt.s32.totalorder %v592_v6, 512 }
  0x4d   : > { %451 = vmatpush.bf16.msra.mxu0 %v1088_v7  ;;  %1118 = vmatpush.bf16.msra.mxu1 %v1088_v7 }
  0x4e   : > { %1119 = vmatpush.bf16.msra.mxu2 %v1088_v7  ;;  %1120 = vmatpush.bf16.msra.mxu3 %v1088_v7 }
  0x50   : > { %452 = vmatmul.bf16.vlgmr.msra.gmra.mxu0 %v1072_v8  ;;  %472 = vmatmul.bf16.vlgmr.msra.gmra.mxu1 %v1076_v9  ;;  %v571_v8 = vadd.s32 %v1517_v27, %v537_v59 }
  0x51   : > { %492 = vmatmul.bf16.vlgmr.msra.gmra.mxu2 %v1080_v10  ;;  %512 = vmatmul.bf16.vlgmr.msra.gmra.mxu3 %v1084_v11  ;;  %v559_v10 = vadd.s32 200, %v1511_v25 }
  0x52   : > { %vm603_vm9 = vcmp.lt.s32.totalorder %v571_v8, 512 }
  0x60   : > { %457 = vmatmul.bf16.gmra.mxu0 %v1073_v12  ;;  %477 = vmatmul.bf16.gmra.mxu1 %v1077_v13  ;;  %v586_v13 = vadd.s32 %v1517_v27, %v552_v61  ;;  %v588_v61 = vadd.s32 %v1517_v27, %v554_v43 }
  0x61   : > { %497 = vmatmul.bf16.gmra.mxu2 %v1081_v14  ;;  %517 = vmatmul.bf16.gmra.mxu3 %v1085_v15  ;;  %v579_v14 = vadd.s32 %v1517_v27, %v545_v1  ;;  %v595_v1 = vadd.s32 %v1517_v27, %v561_v55 }
  0x62   : > { %vm618_vm10 = vcmp.lt.s32.totalorder %v586_v13, 512 }
  0x63   : > { %vm611_vm11 = vcmp.lt.s32.totalorder %v579_v14, 512 }
  0x70   : > { %462 = vmatmul.bf16.gmra.mxu0 %v1074_v16  ;;  %482 = vmatmul.bf16.gmra.mxu1 %v1078_v17  ;;  %v593_v17 = vadd.s32 %v1517_v27, %v559_v10 }
  0x71   : > { %502 = vmatmul.bf16.gmra.mxu2 %v1082_v18  ;;  %522 = vmatmul.bf16.gmra.mxu3 %v1086_v19  ;;  %v538_v18 = vadd.s32 32, %v1511_v25 }
  0x72   : > { %vm625_vm12 = vcmp.lt.s32.totalorder %v593_v17, 512 }
  0x80   : > { %467 = vmatmul.bf16.gmra.mxu0 %v1075_v20  ;;  %487 = vmatmul.bf16.gmra.mxu1 %v1079_v21  ;;  %v553_v20 = vadd.s32 152, %v1511_v25 }
  0x81   : > { %507 = vmatmul.bf16.gmra.mxu2 %v1083_v22  ;;  %527 = vmatmul.bf16.gmra.mxu3 %v1087_v23  ;;  %v546_v23 = vadd.s32 96, %v1511_v25 }
  0xcd   : > { %v453_v32 = vpop.f32.mrf.mxu0  ;;  %v473_v34 = vpop.f32.mrf.mxu1 }
  0xce   : > { %v454_v36 = vadd.f32 %v1525_v30, %v453_v32  ;;  %v474_v37 = vadd.f32 %v1525_v30, %v473_v34  ;;  %v572_v34 = vadd.s32 %v1517_v27, %v538_v18 }
  0xd0   : > { %v1533_v38 = vsel %vm600_vm0, %v454_v36, 0.0  ;;  %v1535_v39 = vsel %vm608_vm1, %v474_v37, 0.0  ;;  %v587_v36 = vadd.s32 %v1517_v27, %v553_v20  ;;  %v580_v37 = vadd.s32 %v1517_v27, %v546_v23 }
  0xd1   : > { %664 = vst [vmem:[%s1538_s23] sm:$0xff] %v1533_v38  ;;  %vm604_vm13 = vcmp.lt.s32.totalorder %v572_v34, 512  ;;  %vm626_vm0 = vcmp.lt.s32.totalorder %v594_v48, 512  ;;  %vm605_vm1 = vcmp.lt.s32.totalorder %v573_v57, 512  ;;  %v734_v18 = vmul.f32 %v1533_v38, %v1533_v38 }
  0xd2   : > { %672 = vst [vmem:[%s1538_s23 + $0x40] sm:$0xff] %v1535_v39  ;;  %vm619_vm14 = vcmp.lt.s32.totalorder %v587_v36, 512  ;;  %vm612_vm15 = vcmp.lt.s32.totalorder %v580_v37, 512  ;;  %v549_v37 = vadd.s32 120, %v1511_v25 }
  0xd4   : > { %v493_v44 = vpop.f32.mrf.mxu2  ;;  %v513_v52 = vpop.f32.mrf.mxu3 }
  0xd5   : > { %v455_v46 = vpop.f32.mrf.mxu0  ;;  %v475_v47 = vpop.f32.mrf.mxu1  ;;  %v494_v49 = vadd.f32 %v1525_v30, %v493_v44  ;;  %v514_v3 = vadd.f32 %v1525_v30, %v513_v52 }
  0xd6   : > { %v456_v50 = vadd.f32 %v1525_v30, %v455_v46  ;;  %v476_v51 = vadd.f32 %v1525_v30, %v475_v47  ;;  %v547_v46 = vadd.s32 104, %v1511_v25 }
  0xd7   : > { %v1552_v53 = vsel %vm616_vm2, %v494_v49, 0.0  ;;  %v1591_v15 = vsel %vm624_vm8, %v514_v3, 0.0  ;;  %vm620_vm2 = vcmp.lt.s32.totalorder %v588_v61, 512 }
  0xd8   : > { %v1554_v54 = vsel %vm601_vm3, %v456_v50, 0.0  ;;  %v1557_v56 = vsel %vm609_vm4, %v476_v51, 0.0  ;;  %680 = vst [vmem:[%s1538_s23 + $0x80] sm:$0xff] %v1552_v53  ;;  %vm627_vm3 = vcmp.lt.s32.totalorder %v595_v1, 512 }
  0xd9   : > { %665 = vst [vmem:[%s1538_s23 + $0x8] sm:$0xff] %v1554_v54  ;;  %v735_v13 = vmul.f32 %v1554_v54, %v1554_v54 }
  0xda   : > { %673 = vst [vmem:[%s1538_s23 + $0x48] sm:$0xff] %v1557_v56 }
  0xdb   : > { %688 = vst [vmem:[%s1538_s23 + $0xc0] sm:$0xff] %v1591_v15 }
  0xdc   : > { %v495_v60 = vpop.f32.mrf.mxu2  ;;  %v515_v7 = vpop.f32.mrf.mxu3 }
  0xdd   : > { %v458_v63 = vpop.f32.mrf.mxu0  ;;  %v478_v0 = vpop.f32.mrf.mxu1  ;;  %v496_v2 = vadd.f32 %v1525_v30, %v495_v60  ;;  %v516_v16 = vadd.f32 %v1525_v30, %v515_v7  ;;  %v548_v7 = vadd.s32 112, %v1511_v25 }
  0xde   : > { %v459_v4 = vadd.f32 %v1525_v30, %v458_v63  ;;  %v479_v5 = vadd.f32 %v1525_v30, %v478_v0  ;;  %v581_v63 = vadd.s32 %v1517_v27, %v547_v46 }
  0xdf   : > { %v1577_v9 = vsel %vm617_vm6, %v496_v2, 0.0  ;;  %v1605_v29 = vsel %vm625_vm12, %v516_v16, 0.0  ;;  %v540_v2 = vadd.s32 48, %v1511_v25 }
  0xe0   : > { %v1581_v11 = vsel %vm602_vm5, %v459_v4, 0.0  ;;  %v1583_v12 = vsel %vm610_vm7, %v479_v5, 0.0  ;;  %681 = vst [vmem:[%s1538_s23 + $0x88] sm:$0xff] %v1577_v9  ;;  %v555_v4 = vadd.s32 168, %v1511_v25  ;;  %vm613_vm4 = vcmp.lt.s32.totalorder %v581_v63, 512 }
  0xe1   : > { %666 = vst [vmem:[%s1538_s23 + $0x10] sm:$0xff] %v1581_v11  ;;  %v736_v36 = vmul.f32 %v1581_v11, %v1581_v11 }
  0xe2   : > { %674 = vst [vmem:[%s1538_s23 + $0x50] sm:$0xff] %v1583_v12  ;;  %v589_v23 = vadd.s32 %v1517_v27, %v555_v4 }
  0xe3   : > { %689 = vst [vmem:[%s1538_s23 + $0xc8] sm:$0xff] %v1605_v29 }
  0xe4   : > { %v498_v19 = vpop.f32.mrf.mxu2  ;;  %v518_v31 = vpop.f32.mrf.mxu3  ;;  %vm621_vm6 = vcmp.lt.s32.totalorder %v589_v23, 512 }
  0xe5   : > { %v460_v21 = vpop.f32.mrf.mxu0  ;;  %v480_v22 = vpop.f32.mrf.mxu1  ;;  %v499_v24 = vadd.f32 %v1525_v30, %v498_v19  ;;  %v519_v51 = vadd.f32 %v1525_v30, %v518_v31  ;;  %v766_v31 = vadd.f32 %v735_v13, %v734_v18 }
  0xe6   : > { %v461_v26 = vadd.f32 %v1525_v30, %v460_v21  ;;  %v481_v28 = vadd.f32 %v1525_v30, %v480_v22  ;;  %v574_v21 = vadd.s32 %v1517_v27, %v540_v2 }
  0xe7   : > { %v1607_v32 = vsel %vm618_vm10, %v499_v24, 0.0  ;;  %v1646_v62 = vsel %vm626_vm0, %v519_v51, 0.0  ;;  %v696_v24 = vadd.f32 %v1554_v54, %v1533_v38  ;;  %v556_v38 = vadd.s32 176, %v1511_v25 }
  0xe8   : > { %v1612_v33 = vsel %vm603_vm9, %v461_v26, 0.0  ;;  %v1615_v35 = vsel %vm611_vm11, %v481_v28, 0.0  ;;  %682 = vst [vmem:[%s1538_s23 + $0x90] sm:$0xff] %v1607_v32  ;;  %v541_v26 = vadd.s32 56, %v1511_v25  ;;  %v582_v28 = vadd.s32 %v1517_v27, %v548_v7 }
  0xe9   : > { %667 = vst [vmem:[%s1538_s23 + $0x18] sm:$0xff] %v1612_v33  ;;  %v697_v34 = vadd.f32 %v696_v24, %v1581_v11  ;;  %vm606_vm5 = vcmp.lt.s32.totalorder %v574_v21, 512  ;;  %v563_v54 = vadd.s32 232, %v1511_v25  ;;  %v596_v11 = vadd.s32 %v1517_v27, %v562_v40 }
  0xea   : > { %675 = vst [vmem:[%s1538_s23 + $0x58] sm:$0xff] %v1615_v35  ;;  %v575_v43 = vadd.s32 %v1517_v27, %v541_v26  ;;  %vm614_vm7 = vcmp.lt.s32.totalorder %v582_v28, 512  ;;  %v737_v51 = vmul.f32 %v1612_v33, %v1612_v33  ;;  %v590_v63 = vadd.s32 %v1517_v27, %v556_v38 }
  0xeb   : > { %690 = vst [vmem:[%s1538_s23 + $0xd0] sm:$0xff] %v1646_v62  ;;  %vm628_vm8 = vcmp.lt.s32.totalorder %v596_v11, 512  ;;  %v767_v1 = vadd.f32 %v766_v31, %v736_v36  ;;  %v698_v2 = vadd.f32 %v697_v34, %v1612_v33  ;;  %v557_v33 = vadd.s32 184, %v1511_v25 }
  0xec   : > { %v500_v42 = vpop.f32.mrf.mxu2  ;;  %v520_v52 = vpop.f32.mrf.mxu3  ;;  %vm607_vm10 = vcmp.lt.s32.totalorder %v575_v43, 512  ;;  %vm622_vm12 = vcmp.lt.s32.totalorder %v590_v63, 512  ;;  %v743_v11 = vmul.f32 %v1557_v56, %v1557_v56 }
  0xed   : > { %v463_v44 = vpop.f32.mrf.mxu0  ;;  %v483_v45 = vpop.f32.mrf.mxu1  ;;  %v501_v47 = vadd.f32 %v1525_v30, %v500_v42  ;;  %v521_v0 = vadd.f32 %v1525_v30, %v520_v52  ;;  %v583_v52 = vadd.s32 %v1517_v27, %v549_v37  ;;  %v591_v37 = vadd.s32 %v1517_v27, %v557_v33 }
  0xee   : > { %v464_v49 = vadd.f32 %v1525_v30, %v463_v44  ;;  %v484_v50 = vadd.f32 %v1525_v30, %v483_v45 }
  0xef   : > { %v1636_v58 = vsel %vm619_vm14, %v501_v47, 0.0  ;;  %v1661_v10 = vsel %vm627_vm3, %v521_v0, 0.0  ;;  %vm615_vm11 = vcmp.lt.s32.totalorder %v583_v52, 512 }
  0xf0   : > { %v1639_v59 = vsel %vm604_vm13, %v464_v49, 0.0  ;;  %v1641_v60 = vsel %vm612_vm15, %v484_v50, 0.0  ;;  %683 = vst [vmem:[%s1538_s23 + $0x98] sm:$0xff] %v1636_v58  ;;  %v597_v50 = vadd.s32 %v1517_v27, %v563_v54  ;;  %v742_v54 = vmul.f32 %v1535_v39, %v1535_v39 }
  0xf1   : > { %668 = vst [vmem:[%s1538_s23 + $0x20] sm:$0xff] %v1639_v59  ;;  %vm623_vm13 = vcmp.lt.s32.totalorder %v591_v37, 512 }
  0xf2   : > { %676 = vst [vmem:[%s1538_s23 + $0x60] sm:$0xff] %v1641_v60  ;;  %vm629_vm9 = vcmp.lt.s32.totalorder %v597_v50, 512 }
  0xf3   : > { %691 = vst [vmem:[%s1538_s23 + $0xd8] sm:$0xff] %v1661_v10 }
  0xf4   : > { %v503_v3 = vpop.f32.mrf.mxu2  ;;  %v523_v17 = vpop.f32.mrf.mxu3 }
  0xf5   : > { %v465_v5 = vpop.f32.mrf.mxu0  ;;  %v485_v6 = vpop.f32.mrf.mxu1  ;;  %v504_v8 = vadd.f32 %v1525_v30, %v503_v3  ;;  %v524_v48 = vadd.f32 %v1525_v30, %v523_v17  ;;  %v738_v3 = vmul.f32 %v1639_v59, %v1639_v59 }
  0xf6   : > { %v466_v14 = vadd.f32 %v1525_v30, %v465_v5  ;;  %v486_v16 = vadd.f32 %v1525_v30, %v485_v6  ;;  %v768_v5 = vadd.f32 %v767_v1, %v737_v51  ;;  %v699_v6 = vadd.f32 %v698_v2, %v1639_v59 }
  0xf7   : > { %v1671_v19 = vsel %vm620_vm2, %v504_v8, 0.0  ;;  %v1713_v0 = vsel %vm628_vm8, %v524_v48, 0.0 }
  0xf8   : > { %v637_v20 = vsel %vm605_vm1, %v466_v14, 0.0  ;;  %v1675_v22 = vsel %vm613_vm4, %v486_v16, 0.0  ;;  %684 = vst [vmem:[%s1538_s23 + $0xa0] sm:$0xff] %v1671_v19  ;;  %v769_v14 = vadd.f32 %v768_v5, %v738_v3 }
  0xf9   : > { %669 = vst [vmem:[%s1538_s23 + $0x28] sm:$0xff] %v637_v20  ;;  %v739_v7 = vmul.f32 %v637_v20, %v637_v20  ;;  %v700_v16 = vadd.f32 %v699_v6, %v637_v20 }
  0xfa   : > { %677 = vst [vmem:[%s1538_s23 + $0x68] sm:$0xff] %v1675_v22 }
  0xfb   : > { %692 = vst [vmem:[%s1538_s23 + $0xe0] sm:$0xff] %v1713_v0  ;;  %v770_v28 = vadd.f32 %v769_v14, %v739_v7 }
  0xfc   : > { %v505_v41 = vpop.f32.mrf.mxu2  ;;  %v525_v49 = vpop.f32.mrf.mxu3 }
  0xfd   : > { %v468_v42 = vpop.f32.mrf.mxu0  ;;  %v488_v44 = vpop.f32.mrf.mxu1  ;;  %v506_v45 = vadd.f32 %v1525_v30, %v505_v41  ;;  %v526_v4 = vadd.f32 %v1525_v30, %v525_v49 }
  0xfe   : > { %v469_v46 = vadd.f32 %v1525_v30, %v468_v42  ;;  %v489_v47 = vadd.f32 %v1525_v30, %v488_v44  ;;  %v564_v44 = vadd.s32 240, %v1511_v25 }
  0xff   : > { %v1705_v55 = vsel %vm621_vm6, %v506_v45, 0.0  ;;  %v1726_v13 = vsel %vm629_vm9, %v526_v4, 0.0  ;;  %v565_v45 = vadd.s32 248, %v1511_v25 }
 0x100   : > { %v638_v57 = vsel %vm606_vm5, %v469_v46, 0.0  ;;  %v1708_v61 = vsel %vm614_vm7, %v489_v47, 0.0  ;;  %685 = vst [vmem:[%s1538_s23 + $0xa8] sm:$0xff] %v1705_v55  ;;  %v598_v50 = vadd.s32 %v1517_v27, %v564_v44 }
 0x101   : > { %670 = vst [vmem:[%s1538_s23 + $0x30] sm:$0xff] %v638_v57  ;;  %v740_v17 = vmul.f32 %v638_v57, %v638_v57  ;;  %v701_v31 = vadd.f32 %v700_v16, %v638_v57  ;;  %v599_v52 = vadd.s32 %v1517_v27, %v565_v45  ;;  %v745_v27 = vmul.f32 %v1615_v35, %v1615_v35 }
 0x102   : > { %678 = vst [vmem:[%s1538_s23 + $0x70] sm:$0xff] %v1708_v61  ;;  %vm630_vm14 = vcmp.lt.s32.totalorder %v598_v50, 512 }
 0x103   : > { %693 = vst [vmem:[%s1538_s23 + $0xe8] sm:$0xff] %v1726_v13  ;;  %v771_v40 = vadd.f32 %v770_v28, %v740_v17  ;;  %vm631_vm15 = vcmp.lt.s32.totalorder %v599_v52, 512 }
 0x104   : > { %v508_v8 = vpop.f32.mrf.mxu2  ;;  %v528_v26 = vpop.f32.mrf.mxu3 }
 0x105   : > { %v470_v18 = vpop.f32.mrf.mxu0  ;;  %v490_v21 = vpop.f32.mrf.mxu1  ;;  %v509_v59 = vadd.f32 %v1525_v30, %v508_v8  ;;  %v529_v25 = vadd.f32 %v1525_v30, %v528_v26 }
 0x106   : > { %v471_v23 = vadd.f32 %v1525_v30, %v470_v18  ;;  %v491_v24 = vadd.f32 %v1525_v30, %v490_v21 }
 0x107   : > { %v1733_v34 = vsel %vm622_vm12, %v509_v59, 0.0  ;;  %v1770_v1 = vsel %vm630_vm14, %v529_v25, 0.0 }
 0x108   : > { %v639_v20 = vsel %vm607_vm10, %v471_v23, 0.0  ;;  %v1737_v36 = vsel %vm615_vm11, %v491_v24, 0.0  ;;  %686 = vst [vmem:[%s1538_s23 + $0xb0] sm:$0xff] %v1733_v34 }
 0x109   : > { %671 = vst [vmem:[%s1538_s23 + $0x38] sm:$0xff] %v639_v20  ;;  %v702_v41 = vadd.f32 %v701_v31, %v639_v20  ;;  %v741_v38 = vmul.f32 %v639_v20, %v639_v20 }
 0x10a   : > { %679 = vst [vmem:[%s1538_s23 + $0x78] sm:$0xff] %v1737_v36 }
 0x10b   : > { %v703_v42 = vadd.f32 %v702_v41, %v1535_v39  ;;  %v772_v43 = vadd.f32 %v771_v40, %v741_v38  ;;  %v744_v39 = vmul.f32 %v1583_v12, %v1583_v12  ;;  %694 = vst [vmem:[%s1538_s23 + $0xf0] sm:$0xff] %v1770_v1 }
 0x10c   : > { %v510_v46 = vpop.f32.mrf.mxu2  ;;  %v530_v51 = vpop.f32.mrf.mxu3 }
 0x10d   : > { %v704_v47 = vadd.f32 %v703_v42, %v1557_v56  ;;  %v773_v48 = vadd.f32 %v772_v43, %v742_v54  ;;  %v511_v49 = vadd.f32 %v1525_v30, %v510_v46  ;;  %v531_v2 = vadd.f32 %v1525_v30, %v530_v51 }
 0x10e   : > { %v746_v30 = vmul.f32 %v1641_v60, %v1641_v60 }
 0x10f   : > { %v705_v57 = vadd.f32 %v704_v47, %v1583_v12  ;;  %v774_v63 = vadd.f32 %v773_v48, %v743_v11  ;;  %v1766_v56 = vsel %vm623_vm13, %v511_v49, 0.0  ;;  %v1782_v4 = vsel %vm631_vm15, %v531_v2, 0.0 }
 0x110   : > { %687 = vst [vmem:[%s1538_s23 + $0xb8] sm:$0xff] %v1766_v56 }
 0x111   : > { %v775_v12 = vadd.f32 %v774_v63, %v744_v39  ;;  %v706_v3 = vadd.f32 %v705_v57, %v1615_v35  ;;  %695 = vst [vmem:[%s1538_s23 + $0xf8] sm:$0xff] %v1782_v4 }
 0x113   : > { %v707_v5 = vadd.f32 %v706_v3, %v1641_v60  ;;  %v776_v6 = vadd.f32 %v775_v12, %v745_v27 }
 0x114   : > { %1275 = shalt.err (!%p1272_p10)
}
 0x115   : > { %s1355_s30 = smov 128   ;;  %s1356_s5 = smov 8   ;;  %v747_v35 = vmul.f32 %v1675_v22, %v1675_v22  ;;  %v708_v60 = vadd.f32 %v707_v5, %v1675_v22  ;;  %v777_v7 = vadd.f32 %v776_v6, %v746_v30  ;;  %v748_v33 = vmul.f32 %v1708_v61, %v1708_v61 }
 0x116   : > { %1127 = dma.vmem_to_hbm [thread:$0]  (%p1451_p3), %s1773_s11, 4096, %s1775_s13, %s805_s12, %s1355_s30, %s1355_s30, %s1356_s5   ;;  %v749_v18 = vmul.f32 %v1737_v36, %v1737_v36  ;;  %v750_v21 = vmul.f32 %v1552_v53, %v1552_v53  ;;  %v751_v22 = vmul.f32 %v1577_v9, %v1577_v9  ;;  %v753_v20 = vmul.f32 %v1636_v58, %v1636_v58 }
 0x117   : > { %v709_v8 = vadd.f32 %v708_v60, %v1708_v61  ;;  %v778_v14 = vadd.f32 %v777_v7, %v747_v35  ;;  %v752_v61 = vmul.f32 %v1607_v32, %v1607_v32  ;;  %v755_v38 = vmul.f32 %v1705_v55, %v1705_v55  ;;  %s966_s23 = sshll.u32 %s1481_s10, 1  ;;  %s1068_s25 = sshll.u32 %s1403_s19, 1 }
 0x118   : > { %v756_v43 = vmul.f32 %v1733_v34, %v1733_v34  ;;  %v757_v45 = vmul.f32 %v1766_v56, %v1766_v56  ;;  %v761_v39 = vmul.f32 %v1661_v10, %v1661_v10  ;;  %v763_v63 = vmul.f32 %v1726_v13, %v1726_v13  ;;  %s837_s11 = scalar_lea.hbm %s1898_s4, %s1068_s25  ;;  %s245_s13 = scalar_lea.vmem [#allocation8], %s966_s23 }
 0x119   : > { %v779_v16 = vadd.f32 %v778_v14, %v748_v33  ;;  %v710_v17 = vadd.f32 %v709_v8, %v1737_v36  ;;  %s839_s12 = sshll.u32 %s245_s13, 4  ;;  %s841_s14 = sshll.u32 %s837_s11, 4  ;;  %s840_s12 = int_to_ptr.vmem [resolvable:$true] %s839_s12  ;;  %s842_s14 = int_to_ptr.hbm [resolvable:$true] %s841_s14 }
 0x11a   : > { %s810_s19 = scalar_lea.sflag [#allocation9], %s1481_s10  ;;  %s1290_s20 = sshra.s32 %s842_s14, 4  ;;  %s1291_s20 = int_to_ptr.hbm [resolvable:$true] %s1290_s20 }
 0x11b   : > { %v711_v59 = vadd.f32 %v710_v17, %v1552_v53  ;;  %v780_v23 = vadd.f32 %v779_v16, %v749_v18  ;;  %v754_v53 = vmul.f32 %v1671_v19, %v1671_v19  ;;  %s1292_s24 = scalar_lea.hbm %s1291_s20, 2  ;;  %s1296_s21 = scalar_lea.hbm %s1898_s4, 4 }
 0x11c   : > { %p1293_p12 = scmp.ne.s32.totalorder %s1291_s20, %s1292_s24  ;;  %p1297_p5 = scmp.lt.s32.totalorder %s1291_s20, %s1898_s4 }
 0x11d   : > { %v712_v24 = vadd.f32 %v711_v59, %v1577_v9  ;;  %v781_v26 = vadd.f32 %v780_v23, %v750_v21  ;;  %p1298_p7 = scmp.lt.s32.totalorder %s1296_s21, %s1292_s24 }
 0x11e   : > { %p1294_p13 = pnand %p1293_p12, %p1451_p3 }
 0x11f   : > { %v782_v28 = vadd.f32 %v781_v26, %v751_v22  ;;  %v713_v31 = vadd.f32 %v712_v24, %v1607_v32  ;;  %p1299_p1 = por %p1298_p7, %p1297_p5 }
 0x120   : > { %p1295_p0 = pneg %p1294_p13 }
 0x121   : > { %v714_v36 = vadd.f32 %v713_v31, %v1636_v58  ;;  %v783_v37 = vadd.f32 %v782_v28, %v752_v61 }
 0x122   : > { %p1300_p4 = pnand %p1299_p1, %p1295_p0 }
 0x123   : > { %v715_v40 = vadd.f32 %v714_v36, %v1671_v19  ;;  %v784_v41 = vadd.f32 %v783_v37, %v753_v20  ;;  %v758_v19 = vmul.f32 %v1591_v15, %v1591_v15 }
 0x125   : > { %v716_v9 = vadd.f32 %v715_v40, %v1705_v55  ;;  %v785_v54 = vadd.f32 %v784_v41, %v754_v53  ;;  %v759_v55 = vmul.f32 %v1605_v29, %v1605_v29 }
 0x127   : > { %v786_v42 = vadd.f32 %v785_v54, %v755_v38  ;;  %v717_v32 = vadd.f32 %v716_v9, %v1733_v34  ;;  %v760_v34 = vmul.f32 %v1646_v62, %v1646_v62 }
 0x129   : > { %v787_v58 = vadd.f32 %v786_v42, %v756_v43  ;;  %v718_v44 = vadd.f32 %v717_v32, %v1766_v56 }
 0x12b   : > { %v719_v11 = vadd.f32 %v718_v44, %v1591_v15  ;;  %v788_v46 = vadd.f32 %v787_v58, %v757_v45  ;;  %v762_v15 = vmul.f32 %v1713_v0, %v1713_v0 }
 0x12d   : > { %v720_v47 = vadd.f32 %v719_v11, %v1605_v29  ;;  %v789_v48 = vadd.f32 %v788_v46, %v758_v19 }
 0x12f   : > { %v790_v49 = vadd.f32 %v789_v48, %v759_v55  ;;  %v721_v50 = vadd.f32 %v720_v47, %v1646_v62 }
 0x131   : > { %v722_v25 = vadd.f32 %v721_v50, %v1661_v10  ;;  %v791_v51 = vadd.f32 %v790_v49, %v760_v34  ;;  %v764_v10 = vmul.f32 %v1770_v1, %v1770_v1 }
 0x133   : > { %v723_v52 = vadd.f32 %v722_v25, %v1713_v0  ;;  %v792_v29 = vadd.f32 %v791_v51, %v761_v39  ;;  %v765_v0 = vmul.f32 %v1782_v4, %v1782_v4 }
 0x135   : > { %v724_v57 = vadd.f32 %v723_v52, %v1726_v13  ;;  %v793_v62 = vadd.f32 %v792_v29, %v762_v15 }
 0x137   : > { %v794_v56 = vadd.f32 %v793_v62, %v763_v63  ;;  %v725_v2 = vadd.f32 %v724_v57, %v1770_v1 }
 0x139   : > { %v795_v27 = vadd.f32 %v794_v56, %v764_v10  ;;  %v726_v12 = vadd.f32 %v725_v2, %v1782_v4 }
 0x13b   : > { %v727_v3 = vrot.slane %v726_v12, 4  ;;  %v796_v30 = vadd.f32 %v795_v27, %v765_v0 }
 0x13d   : > { %v728_v5 = vadd.f32 %v727_v3, %v726_v12  ;;  %v797_v6 = vrot.slane %v796_v30, 4 }
 0x13f   : > { %v729_v13 = vrot.slane %v728_v5, 2  ;;  %v798_v35 = vadd.f32 %v797_v6, %v796_v30 }
 0x141   : > { %v730_v60 = vadd.f32 %v729_v13, %v728_v5  ;;  %v799_v7 = vrot.slane %v798_v35, 2 }
 0x143   : > { %v731_v1 = vrot.slane %v730_v60, 1  ;;  %v800_v8 = vadd.f32 %v799_v7, %v798_v35 }
 0x145   : > { %v732_v4 = vadd.f32 %v731_v1, %v730_v60  ;;  %v801_v33 = vrot.slane %v800_v8, 1 }
 0x147   : > { %v802_v14 = vadd.f32 %v801_v33, %v800_v8  ;;  %733 = vst [vmem:[%s245_s13] sm:$0x1] %v732_v4 }
 0x149   : > { %803 = vst [vmem:[%s245_s13 + $0x1] sm:$0x1] %v802_v14 }
 0x14a   : > { %1303 = shalt.err (!%p1300_p4)
}
 0x14b   : > { %1128 = dma.vmem_to_hbm [thread:$0]  (%p1451_p3), %s840_s12, 32, %s842_s14, %s810_s19  }
 0x14c PF: > { %s853_s10 = sand.u32 1, %s1338_s15   ;;  %p1904_p8 = scmp.ge.s32.totalorder %s1350_s18, 2 }
 0x14d   : > { %s854_s5 = scalar_lea.sflag [#allocation4], %s853_s10 }
 0x14e   : > { %p1140_p11 = pnand %p1904_p8, %p1417_p6 }
 0x150   : > { %p1141_p9 = pneg %p1140_p11 }
 0x152   : > { %1329 = dma.done.wait (%p1141_p9), %s854_s5, 4096  }
 0x153   : > { %1331 = vsyncadd (%p1141_p9), %s854_s5, 4294963200  ;;  %s864_s23 = scalar_lea.sflag [#allocation9], %s853_s10 }
 0x154   : > { %1333 = dma.done.wait (%p1141_p9), %s864_s23, 32  }
 0x155   : > { %1335 = vsyncadd (%p1141_p9), %s864_s23, 4294967264  ;;  %p22_p3 = scmp.ge.s32.totalorder %s1435_s29, 4   ;;  %s1905_s15 = smov %s1342_s16 }
 0x156   : > { %s1906_s16 = smov %s1346_s17  ;;  %s1907_s17 = smov %s1447_s8 }
 0x157   : > { %s1908_s18 = smov %s1435_s29  ;;  %24 = sbr.rel (!%p22_p3) target bundleno = 8 (0x8), region = 98 }
 0x15c   :  { %870 = vsyncpa [#allocation3], 1 }
 0x15d   :  { %872 = vsyncpa [#allocation3 + $0x1], 1 }
 0x15e   :  { %873 = vsyncpa [#allocation6], 1 }
 0x15f   :  { %874 = vsyncpa [#allocation4], 1 }
 0x160   :  { %876 = vsyncpa [#allocation4 + $0x1], 1 }
 0x161   :  { %877 = vsyncpa [#allocation9], 1 }
 0x162   :  { %879 = vsyncpa [#allocation9 + $0x1], 1 }

</bundles_post_ra>
